<compile_context>
chip_gen: v7x
topology: tpu7x:2x2x1
jax: 0.10.0
libtpu: 0.0.40
codegen_flags: <defaults>
</compile_context>

<pallas_src>
import functools

import jax
import jax.numpy as jnp
from jax import lax
from jax.experimental import pallas as pl
from jax.experimental.pallas import tpu as pltpu


def _attention_kernel(x_ref, wqkv_ref, wout_ref, bias_ref, o_ref, *,
                      heads, dim_head, seq_len, batch_block):
    """x_ref: (batch_block*N, D) bf16; wqkv_ref: (D, 3*inner) bf16 (scale folded into Q
    columns); wout_ref: (inner, D) bf16; bias_ref: (1, D) f32; o_ref: (batch_block*N, D) f32."""
    N = seq_len
    inner = heads * dim_head

    x = x_ref[...]                 # (bb*N, D) bf16
    w_qkv = wqkv_ref[...]          # (D, 3*inner) bf16
    bias = bias_ref[...]           # (1, D) f32

    # One fused QKV projection for every row in the block: single fat MXU matmul,
    # f32 accumulation, then a bf16 copy as operand for the attention matmuls.
    qkv_f32 = jnp.dot(x, w_qkv, preferred_element_type=jnp.float32)   # (bb*N, 3*inner)
    qkv = qkv_f32.astype(jnp.bfloat16)

    # Static unroll over (batch-in-block, head); both are tiny at demo shapes.
    # NOTE: the dh=16-wide column slices of `qkv` are sub-lane-tile extracts (dh < 128);
    # acceptable at these sizes, see TODO above for the production-dim fix.
    for b in range(batch_block):
        r0 = b * N
        acc = None
        for h in range(heads):
            c0 = h * dim_head
            q = qkv[r0:r0 + N, c0:c0 + dim_head]                               # (N, dh) bf16
            k = qkv[r0:r0 + N, inner + c0:inner + c0 + dim_head]               # (N, dh) bf16
            v = qkv[r0:r0 + N, 2 * inner + c0:2 * inner + c0 + dim_head]       # (N, dh) bf16

            # q @ k^T (contract last dims directly; softmax scale already folded into q).
            scores = lax.dot_general(
                q, k,
                dimension_numbers=(((1,), (1,)), ((), ())),
                preferred_element_type=jnp.float32,
            )                                                                  # (N, N) f32

            # Max-stabilized softmax in f32; approx reciprocal runs on the EUP slot.
            m = jnp.max(scores, axis=-1, keepdims=True)
            p = jnp.exp(scores - m)
            attn = p * pl.reciprocal(jnp.sum(p, axis=-1, keepdims=True), approx=True)

            # (attn @ v) with bf16 MXU operands, f32 accumulation.
            ctx = jnp.dot(attn.astype(jnp.bfloat16), v,
                          preferred_element_type=jnp.float32)                  # (N, dh) f32

            # Fold this head directly into the output projection:
            #   concat_h(ctx_h) @ w_out  ==  sum_h ctx_h @ w_out[h*dh:(h+1)*dh, :]
            # (static sublane-aligned row slice of the w_out ref; no concatenate).
            head_proj = jnp.dot(ctx.astype(jnp.bfloat16),
                                wout_ref[c0:c0 + dim_head, :],
                                preferred_element_type=jnp.float32)            # (N, D) f32
            acc = head_proj if acc is None else acc + head_proj

        # Single store per batch element (bias added once, in f32).
        o_ref[r0:r0 + N, :] = (acc + bias).astype(o_ref.dtype)


def attention_pallas(x, w_qkv, w_out, bias, *, heads, dim_head, scale, batch_block=None):
    """x: (B, N, D) f32; w_qkv: (D, 3*H*dh); w_out: (H*dh, D); bias: (1, D)."""
    B, N, D = x.shape
    inner = heads * dim_head
    assert w_qkv.shape == (D, 3 * inner)
    assert w_out.shape == (inner, D)
    assert N % 8 == 0, "sequence length must be a multiple of 8 (sublane tile)"

    if batch_block is None:
        batch_block = B            # one fat grid step for small B (~0.35us/step amortized)
    assert B % batch_block == 0
    grid = (B // batch_block,)
    rows = batch_block * N

    # Fold the softmax scale into the Q columns of the fused QKV weight (one-time constant
    # fold outside the kernel), then cast MXU operands to bf16.
    w_qkv_scaled = jnp.concatenate([w_qkv[:, :inner] * scale, w_qkv[:, inner:]], axis=-1)
    x_flat = x.reshape(B * N, D).astype(jnp.bfloat16)      # lane/sublane-denser I/O slab
    w_qkv_b = w_qkv_scaled.astype(jnp.bfloat16)
    w_out_b = w_out.astype(jnp.bfloat16)
    bias_f32 = bias.astype(jnp.float32).reshape(1, D)

    kernel = functools.partial(
        _attention_kernel, heads=heads, dim_head=dim_head,
        seq_len=N, batch_block=batch_block)

    out_flat = pl.pallas_call(
        kernel,
        out_shape=jax.ShapeDtypeStruct((B * N, D), jnp.float32),
        grid_spec=pltpu.PrefetchScalarGridSpec(
            num_scalar_prefetch=0,
            grid=grid,
            in_specs=[
                pl.BlockSpec((rows, D), lambda i: (i, 0)),            # x rows for this step
                pl.BlockSpec((D, 3 * inner), lambda i: (0, 0)),       # fused QKV weight (resident)
                pl.BlockSpec((inner, D), lambda i: (0, 0)),           # fused output weight (resident)
                pl.BlockSpec((1, D), lambda i: (0, 0)),               # output bias (resident)
            ],
            out_specs=pl.BlockSpec((rows, D), lambda i: (i, 0)),
        ),
        compiler_params=pltpu.CompilerParams(
            dimension_semantics=("parallel",),
            vmem_limit_bytes=64 * 1024 * 1024,
        ),
    )(x_flat, w_qkv_b, w_out_b, bias_f32)

    return out_flat.reshape(B, N, D)


def attention_reference(x, w_qkv, w_out, bias, *, heads, scale):
    """Pure-JAX f32 reference mirroring the PyTorch forward."""
    B, N, D = x.shape
    qkv = x @ w_qkv                                    # (B, N, 3*inner)
    q, k, v = jnp.split(qkv, 3, axis=-1)

    def split_heads(t):                                # 'b n (h d) -> b h n d'
        return t.reshape(B, N, heads, -1).transpose(0, 2, 1, 3)

    q, k, v = map(split_heads, (q, k, v))
    dots = jnp.einsum("bhnd,bhmd->bhnm", q, k) * scale
    attn = jax.nn.softmax(dots, axis=-1)
    out = jnp.einsum("bhnm,bhmd->bhnd", attn, v)       # (B, H, N, dh)
    out = out.transpose(0, 2, 1, 3).reshape(B, N, -1)  # 'b h n d -> b n (h d)'
    return out @ w_out + bias


if __name__ == "__main__":
    # Module hyperparameters (small, consistent with Attention(dim, heads, dim_head)).
    B, N = 2, 8
    dim = 32
    heads = 4
    dim_head = 16
    inner_dim = heads * dim_head
    scale = dim_head ** (-0.5)

    key = jax.random.PRNGKey(0)
    kx, kqkv, ko, kb = jax.random.split(key, 4)

    x = jax.random.normal(kx, (B, N, dim), dtype=jnp.float32)

    # to_qkv: Linear(dim, inner_dim*3, bias=False); stored transposed (dim, 3*inner_dim)
    # so the column order is [q_h0..q_hH | k_h0..k_hH | v_h0..v_hH], exactly matching
    # chunk(3) + rearrange in the PyTorch forward.
    w_qkv = jax.random.normal(kqkv, (dim, 3 * inner_dim), dtype=jnp.float32) * 0.05

    # to_out: Linear(inner_dim, dim) -> transposed weight (inner_dim, dim), bias (1, dim).
    w_out = jax.random.normal(ko, (inner_dim, dim), dtype=jnp.float32) * 0.05
    bias = jax.random.normal(kb, (1, dim), dtype=jnp.float32) * 0.05

    out = attention_pallas(x, w_qkv, w_out, bias,
                           heads=heads, dim_head=dim_head, scale=scale)
    out = jax.block_until_ready(out)

    ref = attention_reference(x, w_qkv, w_out, bias, heads=heads, scale=scale)
    # Tolerance loosened for bf16 MXU operands + approx reciprocal (f32 reference).
    assert jnp.allclose(out, ref, atol=2e-2, rtol=2e-2), "mismatch vs JAX reference"

    print("KERNEL_OK")
</pallas_src>

<mosaic_0001>
module attributes {stable_mosaic.version = 11 : i64} {
  func.func @_attention_kernel(%arg0: i32, %arg1: memref<16x32xbf16, #tpu.memory_space<vmem>>, %arg2: memref<32x192xbf16, #tpu.memory_space<vmem>>, %arg3: memref<64x32xbf16, #tpu.memory_space<vmem>>, %arg4: memref<1x32xf32, #tpu.memory_space<vmem>>, %arg5: memref<16x32xf32, #tpu.memory_space<vmem>>) attributes {dimension_semantics = [#tpu.dimension_semantics<parallel>], iteration_bounds = array<i64: 1>, scalar_prefetch = 0 : i64, scratch_operands = 0 : i64, tpu.core_type = #tpu.core_type<tc>, window_params = [{transform_indices = @transform_0, window_bounds = array<i64: 16, 32>}, {pipeline_mode = #tpu.pipeline_mode<synchronous>, transform_indices = @transform_1, window_bounds = array<i64: 32, 192>}, {pipeline_mode = #tpu.pipeline_mode<synchronous>, transform_indices = @transform_2, window_bounds = array<i64: 64, 32>}, {pipeline_mode = #tpu.pipeline_mode<synchronous>, transform_indices = @transform_3, window_bounds = array<i64: 1, 32>}, {transform_indices = @transform_4, window_bounds = array<i64: 16, 32>}]} {
    %c0 = arith.constant 0 : index
    %c0_0 = arith.constant 0 : index
    %0 = vector.load %arg1[%c0, %c0_0] : memref<16x32xbf16, #tpu.memory_space<vmem>>, vector<16x32xbf16>
    %c0_1 = arith.constant 0 : index
    %c0_2 = arith.constant 0 : index
    %1 = vector.load %arg2[%c0_1, %c0_2] : memref<32x192xbf16, #tpu.memory_space<vmem>>, vector<32x192xbf16>
    %c0_3 = arith.constant 0 : index
    %c0_4 = arith.constant 0 : index
    %2 = vector.load %arg4[%c0_3, %c0_4] : memref<1x32xf32, #tpu.memory_space<vmem>>, vector<1x32xf32>
    %cst = arith.constant dense<0.000000e+00> : vector<16x192xf32>
    %3 = tpu.matmul %0, %1, %cst {dimension_numbers = #tpu.dot_dimension_numbers<[1], [0], [0], [1], [0, 0, 1, 1], [], []>} : vector<16x32xbf16>, vector<32x192xbf16>, vector<16x192xf32> -> vector<16x192xf32>
    %4 = arith.truncf %3 : vector<16x192xf32> to vector<16x192xbf16>
    %5 = vector.extract_strided_slice %4 {offsets = [0, 0], sizes = [8, 16], strides = [1, 1]} : vector<16x192xbf16> to vector<8x16xbf16>
    %6 = vector.extract_strided_slice %4 {offsets = [0, 64], sizes = [8, 16], strides = [1, 1]} : vector<16x192xbf16> to vector<8x16xbf16>
    %7 = vector.extract_strided_slice %4 {offsets = [0, 128], sizes = [8, 16], strides = [1, 1]} : vector<16x192xbf16> to vector<8x16xbf16>
    %cst_5 = arith.constant dense<0.000000e+00> : vector<8x8xf32>
    %8 = tpu.matmul %5, %6, %cst_5 {dimension_numbers = #tpu.dot_dimension_numbers<[1], [1], [0], [0], [0, 0, 1, 0], [], []>} : vector<8x16xbf16>, vector<8x16xbf16>, vector<8x8xf32> -> vector<8x8xf32>
    %cst_6 = arith.constant dense<0xFF800000> : vector<8xf32>
    %9 = vector.multi_reduction <maximumf>, %8, %cst_6 [1] : vector<8x8xf32> to vector<8xf32>
    %10 = vector.shape_cast %9 : vector<8xf32> to vector<8x1xf32>
    %11 = vector.broadcast %10 : vector<8x1xf32> to vector<8x8xf32>
    %12 = arith.subf %8, %11 : vector<8x8xf32>
    %13 = math.exp %12 : vector<8x8xf32>
    %cst_7 = arith.constant dense<0.000000e+00> : vector<8xf32>
    %14 = vector.multi_reduction <add>, %13, %cst_7 [1] : vector<8x8xf32> to vector<8xf32>
    %15 = vector.shape_cast %14 : vector<8xf32> to vector<8x1xf32>
    %16 = tpu.reciprocal %15 {approx = true} : vector<8x1xf32> -> vector<8x1xf32>
    %17 = vector.broadcast %16 : vector<8x1xf32> to vector<8x8xf32>
    %18 = arith.mulf %13, %17 : vector<8x8xf32>
    %19 = arith.truncf %18 : vector<8x8xf32> to vector<8x8xbf16>
    %cst_8 = arith.constant dense<0.000000e+00> : vector<8x16xf32>
    %20 = tpu.matmul %19, %7, %cst_8 {dimension_numbers = #tpu.dot_dimension_numbers<[1], [0], [0], [1], [0, 0, 1, 1], [], []>} : vector<8x8xbf16>, vector<8x16xbf16>, vector<8x16xf32> -> vector<8x16xf32>
    %21 = arith.truncf %20 : vector<8x16xf32> to vector<8x16xbf16>
    %c0_9 = arith.constant 0 : index
    %c0_10 = arith.constant 0 : index
    %22 = vector.load %arg3[%c0_9, %c0_10] : memref<64x32xbf16, #tpu.memory_space<vmem>>, vector<16x32xbf16>
    %cst_11 = arith.constant dense<0.000000e+00> : vector<8x32xf32>
    %23 = tpu.matmul %21, %22, %cst_11 {dimension_numbers = #tpu.dot_dimension_numbers<[1], [0], [0], [1], [0, 0, 1, 1], [], []>} : vector<8x16xbf16>, vector<16x32xbf16>, vector<8x32xf32> -> vector<8x32xf32>
    %24 = vector.extract_strided_slice %4 {offsets = [0, 16], sizes = [8, 16], strides = [1, 1]} : vector<16x192xbf16> to vector<8x16xbf16>
    %25 = vector.extract_strided_slice %4 {offsets = [0, 80], sizes = [8, 16], strides = [1, 1]} : vector<16x192xbf16> to vector<8x16xbf16>
    %26 = vector.extract_strided_slice %4 {offsets = [0, 144], sizes = [8, 16], strides = [1, 1]} : vector<16x192xbf16> to vector<8x16xbf16>
    %cst_12 = arith.constant dense<0.000000e+00> : vector<8x8xf32>
    %27 = tpu.matmul %24, %25, %cst_12 {dimension_numbers = #tpu.dot_dimension_numbers<[1], [1], [0], [0], [0, 0, 1, 0], [], []>} : vector<8x16xbf16>, vector<8x16xbf16>, vector<8x8xf32> -> vector<8x8xf32>
    %cst_13 = arith.constant dense<0xFF800000> : vector<8xf32>
    %28 = vector.multi_reduction <maximumf>, %27, %cst_13 [1] : vector<8x8xf32> to vector<8xf32>
    %29 = vector.shape_cast %28 : vector<8xf32> to vector<8x1xf32>
    %30 = vector.broadcast %29 : vector<8x1xf32> to vector<8x8xf32>
    %31 = arith.subf %27, %30 : vector<8x8xf32>
    %32 = math.exp %31 : vector<8x8xf32>
    %cst_14 = arith.constant dense<0.000000e+00> : vector<8xf32>
    %33 = vector.multi_reduction <add>, %32, %cst_14 [1] : vector<8x8xf32> to vector<8xf32>
    %34 = vector.shape_cast %33 : vector<8xf32> to vector<8x1xf32>
    %35 = tpu.reciprocal %34 {approx = true} : vector<8x1xf32> -> vector<8x1xf32>
    %36 = vector.broadcast %35 : vector<8x1xf32> to vector<8x8xf32>
    %37 = arith.mulf %32, %36 : vector<8x8xf32>
    %38 = arith.truncf %37 : vector<8x8xf32> to vector<8x8xbf16>
    %cst_15 = arith.constant dense<0.000000e+00> : vector<8x16xf32>
    %39 = tpu.matmul %38, %26, %cst_15 {dimension_numbers = #tpu.dot_dimension_numbers<[1], [0], [0], [1], [0, 0, 1, 1], [], []>} : vector<8x8xbf16>, vector<8x16xbf16>, vector<8x16xf32> -> vector<8x16xf32>
    %40 = arith.truncf %39 : vector<8x16xf32> to vector<8x16xbf16>
    %c16 = arith.constant 16 : index
    %c0_16 = arith.constant 0 : index
    %41 = vector.load %arg3[%c16, %c0_16] : memref<64x32xbf16, #tpu.memory_space<vmem>>, vector<16x32xbf16>
    %cst_17 = arith.constant dense<0.000000e+00> : vector<8x32xf32>
    %42 = tpu.matmul %40, %41, %cst_17 {dimension_numbers = #tpu.dot_dimension_numbers<[1], [0], [0], [1], [0, 0, 1, 1], [], []>} : vector<8x16xbf16>, vector<16x32xbf16>, vector<8x32xf32> -> vector<8x32xf32>
    %43 = arith.addf %23, %42 : vector<8x32xf32>
    %44 = vector.extract_strided_slice %4 {offsets = [0, 32], sizes = [8, 16], strides = [1, 1]} : vector<16x192xbf16> to vector<8x16xbf16>
    %45 = vector.extract_strided_slice %4 {offsets = [0, 96], sizes = [8, 16], strides = [1, 1]} : vector<16x192xbf16> to vector<8x16xbf16>
    %46 = vector.extract_strided_slice %4 {offsets = [0, 160], sizes = [8, 16], strides = [1, 1]} : vector<16x192xbf16> to vector<8x16xbf16>
    %cst_18 = arith.constant dense<0.000000e+00> : vector<8x8xf32>
    %47 = tpu.matmul %44, %45, %cst_18 {dimension_numbers = #tpu.dot_dimension_numbers<[1], [1], [0], [0], [0, 0, 1, 0], [], []>} : vector<8x16xbf16>, vector<8x16xbf16>, vector<8x8xf32> -> vector<8x8xf32>
    %cst_19 = arith.constant dense<0xFF800000> : vector<8xf32>
    %48 = vector.multi_reduction <maximumf>, %47, %cst_19 [1] : vector<8x8xf32> to vector<8xf32>
    %49 = vector.shape_cast %48 : vector<8xf32> to vector<8x1xf32>
    %50 = vector.broadcast %49 : vector<8x1xf32> to vector<8x8xf32>
    %51 = arith.subf %47, %50 : vector<8x8xf32>
    %52 = math.exp %51 : vector<8x8xf32>
    %cst_20 = arith.constant dense<0.000000e+00> : vector<8xf32>
    %53 = vector.multi_reduction <add>, %52, %cst_20 [1] : vector<8x8xf32> to vector<8xf32>
    %54 = vector.shape_cast %53 : vector<8xf32> to vector<8x1xf32>
    %55 = tpu.reciprocal %54 {approx = true} : vector<8x1xf32> -> vector<8x1xf32>
    %56 = vector.broadcast %55 : vector<8x1xf32> to vector<8x8xf32>
    %57 = arith.mulf %52, %56 : vector<8x8xf32>
    %58 = arith.truncf %57 : vector<8x8xf32> to vector<8x8xbf16>
    %cst_21 = arith.constant dense<0.000000e+00> : vector<8x16xf32>
    %59 = tpu.matmul %58, %46, %cst_21 {dimension_numbers = #tpu.dot_dimension_numbers<[1], [0], [0], [1], [0, 0, 1, 1], [], []>} : vector<8x8xbf16>, vector<8x16xbf16>, vector<8x16xf32> -> vector<8x16xf32>
    %60 = arith.truncf %59 : vector<8x16xf32> to vector<8x16xbf16>
    %c32 = arith.constant 32 : index
    %c0_22 = arith.constant 0 : index
    %61 = vector.load %arg3[%c32, %c0_22] : memref<64x32xbf16, #tpu.memory_space<vmem>>, vector<16x32xbf16>
    %cst_23 = arith.constant dense<0.000000e+00> : vector<8x32xf32>
    %62 = tpu.matmul %60, %61, %cst_23 {dimension_numbers = #tpu.dot_dimension_numbers<[1], [0], [0], [1], [0, 0, 1, 1], [], []>} : vector<8x16xbf16>, vector<16x32xbf16>, vector<8x32xf32> -> vector<8x32xf32>
    %63 = arith.addf %43, %62 : vector<8x32xf32>
    %64 = vector.extract_strided_slice %4 {offsets = [0, 48], sizes = [8, 16], strides = [1, 1]} : vector<16x192xbf16> to vector<8x16xbf16>
    %65 = vector.extract_strided_slice %4 {offsets = [0, 112], sizes = [8, 16], strides = [1, 1]} : vector<16x192xbf16> to vector<8x16xbf16>
    %66 = vector.extract_strided_slice %4 {offsets = [0, 176], sizes = [8, 16], strides = [1, 1]} : vector<16x192xbf16> to vector<8x16xbf16>
    %cst_24 = arith.constant dense<0.000000e+00> : vector<8x8xf32>
    %67 = tpu.matmul %64, %65, %cst_24 {dimension_numbers = #tpu.dot_dimension_numbers<[1], [1], [0], [0], [0, 0, 1, 0], [], []>} : vector<8x16xbf16>, vector<8x16xbf16>, vector<8x8xf32> -> vector<8x8xf32>
    %cst_25 = arith.constant dense<0xFF800000> : vector<8xf32>
    %68 = vector.multi_reduction <maximumf>, %67, %cst_25 [1] : vector<8x8xf32> to vector<8xf32>
    %69 = vector.shape_cast %68 : vector<8xf32> to vector<8x1xf32>
    %70 = vector.broadcast %69 : vector<8x1xf32> to vector<8x8xf32>
    %71 = arith.subf %67, %70 : vector<8x8xf32>
    %72 = math.exp %71 : vector<8x8xf32>
    %cst_26 = arith.constant dense<0.000000e+00> : vector<8xf32>
    %73 = vector.multi_reduction <add>, %72, %cst_26 [1] : vector<8x8xf32> to vector<8xf32>
    %74 = vector.shape_cast %73 : vector<8xf32> to vector<8x1xf32>
    %75 = tpu.reciprocal %74 {approx = true} : vector<8x1xf32> -> vector<8x1xf32>
    %76 = vector.broadcast %75 : vector<8x1xf32> to vector<8x8xf32>
    %77 = arith.mulf %72, %76 : vector<8x8xf32>
    %78 = arith.truncf %77 : vector<8x8xf32> to vector<8x8xbf16>
    %cst_27 = arith.constant dense<0.000000e+00> : vector<8x16xf32>
    %79 = tpu.matmul %78, %66, %cst_27 {dimension_numbers = #tpu.dot_dimension_numbers<[1], [0], [0], [1], [0, 0, 1, 1], [], []>} : vector<8x8xbf16>, vector<8x16xbf16>, vector<8x16xf32> -> vector<8x16xf32>
    %80 = arith.truncf %79 : vector<8x16xf32> to vector<8x16xbf16>
    %c48 = arith.constant 48 : index
    %c0_28 = arith.constant 0 : index
    %81 = vector.load %arg3[%c48, %c0_28] : memref<64x32xbf16, #tpu.memory_space<vmem>>, vector<16x32xbf16>
    %cst_29 = arith.constant dense<0.000000e+00> : vector<8x32xf32>
    %82 = tpu.matmul %80, %81, %cst_29 {dimension_numbers = #tpu.dot_dimension_numbers<[1], [0], [0], [1], [0, 0, 1, 1], [], []>} : vector<8x16xbf16>, vector<16x32xbf16>, vector<8x32xf32> -> vector<8x32xf32>
    %83 = arith.addf %63, %82 : vector<8x32xf32>
    %84 = vector.broadcast %2 : vector<1x32xf32> to vector<8x32xf32>
    %85 = arith.addf %83, %84 : vector<8x32xf32>
    %c0_30 = arith.constant 0 : index
    %c0_31 = arith.constant 0 : index
    %86 = vector.load %arg5[%c0_30, %c0_31] : memref<16x32xf32, #tpu.memory_space<vmem>>, vector<8x32xf32>
    tpu.vector_store %arg5[%c0_30, %c0_31], %85 {strides = array<i32>} : memref<16x32xf32, #tpu.memory_space<vmem>>, vector<8x32xf32>,
    %87 = vector.extract_strided_slice %4 {offsets = [8, 0], sizes = [8, 16], strides = [1, 1]} : vector<16x192xbf16> to vector<8x16xbf16>
    %88 = vector.extract_strided_slice %4 {offsets = [8, 64], sizes = [8, 16], strides = [1, 1]} : vector<16x192xbf16> to vector<8x16xbf16>
    %89 = vector.extract_strided_slice %4 {offsets = [8, 128], sizes = [8, 16], strides = [1, 1]} : vector<16x192xbf16> to vector<8x16xbf16>
    %cst_32 = arith.constant dense<0.000000e+00> : vector<8x8xf32>
    %90 = tpu.matmul %87, %88, %cst_32 {dimension_numbers = #tpu.dot_dimension_numbers<[1], [1], [0], [0], [0, 0, 1, 0], [], []>} : vector<8x16xbf16>, vector<8x16xbf16>, vector<8x8xf32> -> vector<8x8xf32>
    %cst_33 = arith.constant dense<0xFF800000> : vector<8xf32>
    %91 = vector.multi_reduction <maximumf>, %90, %cst_33 [1] : vector<8x8xf32> to vector<8xf32>
    %92 = vector.shape_cast %91 : vector<8xf32> to vector<8x1xf32>
    %93 = vector.broadcast %92 : vector<8x1xf32> to vector<8x8xf32>
    %94 = arith.subf %90, %93 : vector<8x8xf32>
    %95 = math.exp %94 : vector<8x8xf32>
    %cst_34 = arith.constant dense<0.000000e+00> : vector<8xf32>
    %96 = vector.multi_reduction <add>, %95, %cst_34 [1] : vector<8x8xf32> to vector<8xf32>
    %97 = vector.shape_cast %96 : vector<8xf32> to vector<8x1xf32>
    %98 = tpu.reciprocal %97 {approx = true} : vector<8x1xf32> -> vector<8x1xf32>
    %99 = vector.broadcast %98 : vector<8x1xf32> to vector<8x8xf32>
    %100 = arith.mulf %95, %99 : vector<8x8xf32>
    %101 = arith.truncf %100 : vector<8x8xf32> to vector<8x8xbf16>
    %cst_35 = arith.constant dense<0.000000e+00> : vector<8x16xf32>
    %102 = tpu.matmul %101, %89, %cst_35 {dimension_numbers = #tpu.dot_dimension_numbers<[1], [0], [0], [1], [0, 0, 1, 1], [], []>} : vector<8x8xbf16>, vector<8x16xbf16>, vector<8x16xf32> -> vector<8x16xf32>
    %103 = arith.truncf %102 : vector<8x16xf32> to vector<8x16xbf16>
    %c0_36 = arith.constant 0 : index
    %c0_37 = arith.constant 0 : index
    %104 = vector.load %arg3[%c0_36, %c0_37] : memref<64x32xbf16, #tpu.memory_space<vmem>>, vector<16x32xbf16>
    %cst_38 = arith.constant dense<0.000000e+00> : vector<8x32xf32>
    %105 = tpu.matmul %103, %104, %cst_38 {dimension_numbers = #tpu.dot_dimension_numbers<[1], [0], [0], [1], [0, 0, 1, 1], [], []>} : vector<8x16xbf16>, vector<16x32xbf16>, vector<8x32xf32> -> vector<8x32xf32>
    %106 = vector.extract_strided_slice %4 {offsets = [8, 16], sizes = [8, 16], strides = [1, 1]} : vector<16x192xbf16> to vector<8x16xbf16>
    %107 = vector.extract_strided_slice %4 {offsets = [8, 80], sizes = [8, 16], strides = [1, 1]} : vector<16x192xbf16> to vector<8x16xbf16>
    %108 = vector.extract_strided_slice %4 {offsets = [8, 144], sizes = [8, 16], strides = [1, 1]} : vector<16x192xbf16> to vector<8x16xbf16>
    %cst_39 = arith.constant dense<0.000000e+00> : vector<8x8xf32>
    %109 = tpu.matmul %106, %107, %cst_39 {dimension_numbers = #tpu.dot_dimension_numbers<[1], [1], [0], [0], [0, 0, 1, 0], [], []>} : vector<8x16xbf16>, vector<8x16xbf16>, vector<8x8xf32> -> vector<8x8xf32>
    %cst_40 = arith.constant dense<0xFF800000> : vector<8xf32>
    %110 = vector.multi_reduction <maximumf>, %109, %cst_40 [1] : vector<8x8xf32> to vector<8xf32>
    %111 = vector.shape_cast %110 : vector<8xf32> to vector<8x1xf32>
    %112 = vector.broadcast %111 : vector<8x1xf32> to vector<8x8xf32>
    %113 = arith.subf %109, %112 : vector<8x8xf32>
    %114 = math.exp %113 : vector<8x8xf32>
    %cst_41 = arith.constant dense<0.000000e+00> : vector<8xf32>
    %115 = vector.multi_reduction <add>, %114, %cst_41 [1] : vector<8x8xf32> to vector<8xf32>
    %116 = vector.shape_cast %115 : vector<8xf32> to vector<8x1xf32>
    %117 = tpu.reciprocal %116 {approx = true} : vector<8x1xf32> -> vector<8x1xf32>
    %118 = vector.broadcast %117 : vector<8x1xf32> to vector<8x8xf32>
    %119 = arith.mulf %114, %118 : vector<8x8xf32>
    %120 = arith.truncf %119 : vector<8x8xf32> to vector<8x8xbf16>
    %cst_42 = arith.constant dense<0.000000e+00> : vector<8x16xf32>
    %121 = tpu.matmul %120, %108, %cst_42 {dimension_numbers = #tpu.dot_dimension_numbers<[1], [0], [0], [1], [0, 0, 1, 1], [], []>} : vector<8x8xbf16>, vector<8x16xbf16>, vector<8x16xf32> -> vector<8x16xf32>
    %122 = arith.truncf %121 : vector<8x16xf32> to vector<8x16xbf16>
    %c16_43 = arith.constant 16 : index
    %c0_44 = arith.constant 0 : index
    %123 = vector.load %arg3[%c16_43, %c0_44] : memref<64x32xbf16, #tpu.memory_space<vmem>>, vector<16x32xbf16>
    %cst_45 = arith.constant dense<0.000000e+00> : vector<8x32xf32>
    %124 = tpu.matmul %122, %123, %cst_45 {dimension_numbers = #tpu.dot_dimension_numbers<[1], [0], [0], [1], [0, 0, 1, 1], [], []>} : vector<8x16xbf16>, vector<16x32xbf16>, vector<8x32xf32> -> vector<8x32xf32>
    %125 = arith.addf %105, %124 : vector<8x32xf32>
    %126 = vector.extract_strided_slice %4 {offsets = [8, 32], sizes = [8, 16], strides = [1, 1]} : vector<16x192xbf16> to vector<8x16xbf16>
    %127 = vector.extract_strided_slice %4 {offsets = [8, 96], sizes = [8, 16], strides = [1, 1]} : vector<16x192xbf16> to vector<8x16xbf16>
    %128 = vector.extract_strided_slice %4 {offsets = [8, 160], sizes = [8, 16], strides = [1, 1]} : vector<16x192xbf16> to vector<8x16xbf16>
    %cst_46 = arith.constant dense<0.000000e+00> : vector<8x8xf32>
    %129 = tpu.matmul %126, %127, %cst_46 {dimension_numbers = #tpu.dot_dimension_numbers<[1], [1], [0], [0], [0, 0, 1, 0], [], []>} : vector<8x16xbf16>, vector<8x16xbf16>, vector<8x8xf32> -> vector<8x8xf32>
    %cst_47 = arith.constant dense<0xFF800000> : vector<8xf32>
    %130 = vector.multi_reduction <maximumf>, %129, %cst_47 [1] : vector<8x8xf32> to vector<8xf32>
    %131 = vector.shape_cast %130 : vector<8xf32> to vector<8x1xf32>
    %132 = vector.broadcast %131 : vector<8x1xf32> to vector<8x8xf32>
    %133 = arith.subf %129, %132 : vector<8x8xf32>
    %134 = math.exp %133 : vector<8x8xf32>
    %cst_48 = arith.constant dense<0.000000e+00> : vector<8xf32>
    %135 = vector.multi_reduction <add>, %134, %cst_48 [1] : vector<8x8xf32> to vector<8xf32>
    %136 = vector.shape_cast %135 : vector<8xf32> to vector<8x1xf32>
    %137 = tpu.reciprocal %136 {approx = true} : vector<8x1xf32> -> vector<8x1xf32>
    %138 = vector.broadcast %137 : vector<8x1xf32> to vector<8x8xf32>
    %139 = arith.mulf %134, %138 : vector<8x8xf32>
    %140 = arith.truncf %139 : vector<8x8xf32> to vector<8x8xbf16>
    %cst_49 = arith.constant dense<0.000000e+00> : vector<8x16xf32>
    %141 = tpu.matmul %140, %128, %cst_49 {dimension_numbers = #tpu.dot_dimension_numbers<[1], [0], [0], [1], [0, 0, 1, 1], [], []>} : vector<8x8xbf16>, vector<8x16xbf16>, vector<8x16xf32> -> vector<8x16xf32>
    %142 = arith.truncf %141 : vector<8x16xf32> to vector<8x16xbf16>
    %c32_50 = arith.constant 32 : index
    %c0_51 = arith.constant 0 : index
    %143 = vector.load %arg3[%c32_50, %c0_51] : memref<64x32xbf16, #tpu.memory_space<vmem>>, vector<16x32xbf16>
    %cst_52 = arith.constant dense<0.000000e+00> : vector<8x32xf32>
    %144 = tpu.matmul %142, %143, %cst_52 {dimension_numbers = #tpu.dot_dimension_numbers<[1], [0], [0], [1], [0, 0, 1, 1], [], []>} : vector<8x16xbf16>, vector<16x32xbf16>, vector<8x32xf32> -> vector<8x32xf32>
    %145 = arith.addf %125, %144 : vector<8x32xf32>
    %146 = vector.extract_strided_slice %4 {offsets = [8, 48], sizes = [8, 16], strides = [1, 1]} : vector<16x192xbf16> to vector<8x16xbf16>
    %147 = vector.extract_strided_slice %4 {offsets = [8, 112], sizes = [8, 16], strides = [1, 1]} : vector<16x192xbf16> to vector<8x16xbf16>
    %148 = vector.extract_strided_slice %4 {offsets = [8, 176], sizes = [8, 16], strides = [1, 1]} : vector<16x192xbf16> to vector<8x16xbf16>
    %cst_53 = arith.constant dense<0.000000e+00> : vector<8x8xf32>
    %149 = tpu.matmul %146, %147, %cst_53 {dimension_numbers = #tpu.dot_dimension_numbers<[1], [1], [0], [0], [0, 0, 1, 0], [], []>} : vector<8x16xbf16>, vector<8x16xbf16>, vector<8x8xf32> -> vector<8x8xf32>
    %cst_54 = arith.constant dense<0xFF800000> : vector<8xf32>
    %150 = vector.multi_reduction <maximumf>, %149, %cst_54 [1] : vector<8x8xf32> to vector<8xf32>
    %151 = vector.shape_cast %150 : vector<8xf32> to vector<8x1xf32>
    %152 = vector.broadcast %151 : vector<8x1xf32> to vector<8x8xf32>
    %153 = arith.subf %149, %152 : vector<8x8xf32>
    %154 = math.exp %153 : vector<8x8xf32>
    %cst_55 = arith.constant dense<0.000000e+00> : vector<8xf32>
    %155 = vector.multi_reduction <add>, %154, %cst_55 [1] : vector<8x8xf32> to vector<8xf32>
    %156 = vector.shape_cast %155 : vector<8xf32> to vector<8x1xf32>
    %157 = tpu.reciprocal %156 {approx = true} : vector<8x1xf32> -> vector<8x1xf32>
    %158 = vector.broadcast %157 : vector<8x1xf32> to vector<8x8xf32>
    %159 = arith.mulf %154, %158 : vector<8x8xf32>
    %160 = arith.truncf %159 : vector<8x8xf32> to vector<8x8xbf16>
    %cst_56 = arith.constant dense<0.000000e+00> : vector<8x16xf32>
    %161 = tpu.matmul %160, %148, %cst_56 {dimension_numbers = #tpu.dot_dimension_numbers<[1], [0], [0], [1], [0, 0, 1, 1], [], []>} : vector<8x8xbf16>, vector<8x16xbf16>, vector<8x16xf32> -> vector<8x16xf32>
    %162 = arith.truncf %161 : vector<8x16xf32> to vector<8x16xbf16>
    %c48_57 = arith.constant 48 : index
    %c0_58 = arith.constant 0 : index
    %163 = vector.load %arg3[%c48_57, %c0_58] : memref<64x32xbf16, #tpu.memory_space<vmem>>, vector<16x32xbf16>
    %cst_59 = arith.constant dense<0.000000e+00> : vector<8x32xf32>
    %164 = tpu.matmul %162, %163, %cst_59 {dimension_numbers = #tpu.dot_dimension_numbers<[1], [0], [0], [1], [0, 0, 1, 1], [], []>} : vector<8x16xbf16>, vector<16x32xbf16>, vector<8x32xf32> -> vector<8x32xf32>
    %165 = arith.addf %145, %164 : vector<8x32xf32>
    %166 = vector.broadcast %2 : vector<1x32xf32> to vector<8x32xf32>
    %167 = arith.addf %165, %166 : vector<8x32xf32>
    %c8 = arith.constant 8 : index
    %c0_60 = arith.constant 0 : index
    %168 = vector.load %arg5[%c8, %c0_60] : memref<16x32xf32, #tpu.memory_space<vmem>>, vector<8x32xf32>
    tpu.vector_store %arg5[%c8, %c0_60], %167 {strides = array<i32>} : memref<16x32xf32, #tpu.memory_space<vmem>>, vector<8x32xf32>,
    return
  }
  func.func @transform_0(%arg0: i32) -> (i32, i32) {
    %c0_i32 = arith.constant 0 : i32
    %c0_i32_0 = arith.constant 0 : i32
    return %arg0, %c0_i32 : i32, i32
  }
  func.func @transform_1(%arg0: i32) -> (i32, i32) {
    %c0_i32 = arith.constant 0 : i32
    %c0_i32_0 = arith.constant 0 : i32
    %c0_i32_1 = arith.constant 0 : i32
    return %c0_i32, %c0_i32_0 : i32, i32
  }
  func.func @transform_2(%arg0: i32) -> (i32, i32) {
    %c0_i32 = arith.constant 0 : i32
    %c0_i32_0 = arith.constant 0 : i32
    %c0_i32_1 = arith.constant 0 : i32
    return %c0_i32, %c0_i32_0 : i32, i32
  }
  func.func @transform_3(%arg0: i32) -> (i32, i32) {
    %c0_i32 = arith.constant 0 : i32
    %c0_i32_0 = arith.constant 0 : i32
    %c0_i32_1 = arith.constant 0 : i32
    return %c0_i32, %c0_i32_0 : i32, i32
  }
  func.func @transform_4(%arg0: i32) -> (i32, i32) {
    %c0_i32 = arith.constant 0 : i32
    %c0_i32_0 = arith.constant 0 : i32
    return %arg0, %c0_i32 : i32, i32
  }
}

</mosaic_0001>

<bundles_post_ra>
// kernel: tpu_custom_call.1
= control target key start
LH: loop header
LB: loop body
LE: loop exit
PB: predicated region body
PF: predicated region fallthrough
CT: control target
= control target key end

     0   :  { %9 = vsyncpa [#allocation3], 0  ;;  %s2206_s0 = inlined_call_operand.hbm [shape: bf16[16,32], index: 0, kind: input, shape index: {}]   ;;  %s2207_s1 = inlined_call_operand.hbm [shape: bf16[32,192], index: 1, kind: input, shape index: {}]   ;;  %s2208_s2 = inlined_call_operand.hbm [shape: bf16[64,32], index: 2, kind: input, shape index: {}]   ;;  %s2209_s3 = inlined_call_operand.hbm [shape: f32[1,32], index: 3, kind: input, shape index: {}]   ;;  %s2210_s4 = inlined_call_operand.hbm [shape: f32[16,32], index: 4, kind: output, shape index: {}]  }
   0x1   :  { %10 = vsyncpa [#allocation6], 0 }
   0x2   :  { %11 = vsyncpa [#allocation9], 0 }
   0x3   :  { %12 = vsyncpa [#allocation4], 0  ;;  %s1895_s15 = smov [#allocation5]   ;;  %s1777_s19 = scalar_lea.hbm %s2207_s1, 512 }
   0x4   :  { %s30_s16 = sshll.u32 %s1895_s15, 4  ;;  %p1778_p0 = scmp.ne.s32.totalorder %s2207_s1, %s1777_s19  ;;  %s31_s16 = int_to_ptr.vmem [resolvable:$true] %s30_s16 }
   0x5   :  { %p1781_p1 = scmp.lt.u32.totalorder %s1777_s19, %s2207_s1 }
   0x7   :  { %p1783_p2 = pnand %p1781_p1, %p1778_p0 }
   0x9   :  { %1786 = shalt.err (!%p1783_p2)
}
   0xa   :  { %s1787_s24 = scalar_lea.vmem %s31_s16, 512  ;;  %p1792_p4 = scmp.lt.s32.totalorder %s31_s16, %s31_s16 }
   0xb   :  { %p1788_p3 = scmp.ne.s32.totalorder %s31_s16, %s1787_s24  ;;  %p1793_p5 = scmp.lt.s32.totalorder %s1787_s24, %s1787_s24 }
   0xd   :  { %p1794_p6 = por %p1793_p5, %p1792_p4 }
   0xf   :  { %p1795_p7 = pnand %p1794_p6, %p1788_p3 }
  0x11   :  { %1798 = shalt.err (!%p1795_p7)
}
  0x12   :  { %s1896_s25 = smov 128   ;;  %s1897_s26 = smov 8  }
  0x13   :  { %36 = dma.hbm_to_vmem [thread:$0]  %s2207_s1, 512, %s31_s16, [#allocation6], %s1896_s25, %s1896_s25, %s1897_s26  }
  0x14   :  { %s1898_s29 = smov [#allocation2]   ;;  %s1799_s7 = scalar_lea.hbm %s2206_s0, 128 }
  0x15   :  { %s18_s30 = sshll.u32 %s1898_s29, 4  ;;  %p1800_p8 = scmp.ne.s32.totalorder %s2206_s0, %s1799_s7  ;;  %s19_s30 = int_to_ptr.vmem [resolvable:$true] %s18_s30 }
  0x16   :  { %p1803_p9 = scmp.lt.u32.totalorder %s1799_s7, %s2206_s0 }
  0x18   :  { %p1805_p10 = pnand %p1803_p9, %p1800_p8 }
  0x1a   :  { %1808 = shalt.err (!%p1805_p10)
}
  0x1b   :  { %s1809_s12 = scalar_lea.vmem %s19_s30, 128  ;;  %p1814_p12 = scmp.lt.s32.totalorder %s19_s30, %s19_s30 }
  0x1c   :  { %p1810_p11 = scmp.ne.s32.totalorder %s19_s30, %s1809_s12  ;;  %p1815_p13 = scmp.lt.s32.totalorder %s1809_s12, %s1809_s12 }
  0x1e   :  { %p1816_p0 = por %p1815_p13, %p1814_p12 }
  0x20   :  { %p1817_p1 = pnand %p1816_p0, %p1810_p11 }
  0x22   :  { %1820 = shalt.err (!%p1817_p1)
}
  0x23   :  { %s1899_s1 = smov 64   ;;  %s1900_s13 = smov 4  }
  0x24   :  { %24 = dma.hbm_to_vmem [thread:$0]  %s2206_s0, 128, %s19_s30, [#allocation3], %s1899_s1, %s1899_s1, %s1900_s13  }
  0x25   :  { %s1901_s16 = smov [#allocation7]   ;;  %s1902_s18 = smov [#allocation8]  }
  0x26   :  { %s42_s17 = sshll.u32 %s1901_s16, 4  ;;  %s55_s19 = sshll.u32 %s1902_s18, 4  ;;  %s43_s17 = int_to_ptr.vmem [resolvable:$true] %s42_s17  ;;  %s56_s19 = int_to_ptr.vmem [resolvable:$true] %s55_s19 }
  0x27   :  { %s1821_s22 = scalar_lea.hbm %s2208_s2, 512 }
  0x28   :  { %p1822_p2 = scmp.ne.s32.totalorder %s2208_s2, %s1821_s22  ;;  %p1825_p3 = scmp.lt.u32.totalorder %s1821_s22, %s2208_s2 }
  0x2a   :  { %p1827_p4 = pnand %p1825_p3, %p1822_p2 }
  0x2c   :  { %1830 = shalt.err (!%p1827_p4)
}
  0x2d   :  { %s1831_s0 = scalar_lea.vmem %s43_s17, 512  ;;  %p1836_p6 = scmp.lt.s32.totalorder %s43_s17, %s43_s17 }
  0x2e   :  { %p1832_p5 = scmp.ne.s32.totalorder %s43_s17, %s1831_s0  ;;  %p1837_p7 = scmp.lt.s32.totalorder %s1831_s0, %s1831_s0 }
  0x30   :  { %p1838_p8 = por %p1837_p7, %p1836_p6 }
  0x32   :  { %p1839_p9 = pnand %p1838_p8, %p1832_p5 }
  0x34   :  { %1842 = shalt.err (!%p1839_p9)
}
  0x35   :  { %48 = dma.hbm_to_vmem [thread:$0]  %s2208_s2, 512, %s43_s17, [#allocation6], %s1899_s1, %s1899_s1, %s1900_s13  }
  0x36   :  { %s1843_s7 = scalar_lea.hbm %s2209_s3, 16 }
  0x37   :  { %p1844_p10 = scmp.ne.s32.totalorder %s2209_s3, %s1843_s7  ;;  %p1847_p11 = scmp.lt.u32.totalorder %s1843_s7, %s2209_s3 }
  0x39   :  { %p1849_p12 = pnand %p1847_p11, %p1844_p10 }
  0x3b   :  { %1852 = shalt.err (!%p1849_p12)
}
  0x3c   :  { %s1853_s12 = scalar_lea.vmem %s56_s19, 16  ;;  %s1857_s14 = scalar_lea.vmem %s56_s19, 32 }
  0x3d   :  { %p1854_p13 = scmp.ne.s32.totalorder %s56_s19, %s1853_s12  ;;  %p1858_p0 = scmp.lt.s32.totalorder %s56_s19, %s56_s19 }
  0x3e   :  { %p1859_p1 = scmp.lt.s32.totalorder %s1857_s14, %s1853_s12 }
  0x40   :  { %p1860_p2 = por %p1859_p1, %p1858_p0 }
  0x42   :  { %p1861_p3 = pnand %p1860_p2, %p1854_p13 }
  0x44   :  { %1864 = shalt.err (!%p1861_p3)
}
  0x45   :  { %58 = dma.hbm_to_vmem [thread:$0]  %s2209_s3, 16, %s56_s19, [#allocation9]  }
  0x46   :  { %1887 = dma.done.wait [#allocation3], 128  }
  0x47   :  { %1888 = vsyncadd [#allocation3], 4294967168 }
  0x48   :  { %1889 = dma.done.wait [#allocation6], 1024  }
  0x49   :  { %1890 = vsyncadd [#allocation6], 4294966272 }
  0x4a   :  { %1891 = dma.done.wait [#allocation9], 16  }
  0x4b   :  { %1892 = vsyncadd [#allocation9], 4294967280  ;;  %v1903_v0 = vmov 0   ;;  %v1730_v1 = vld [vmem:[#allocation5 + $0x4] ss:$8 sps:$4 sm:$0xff]   ;;  %vm104_vm0 = vcmask 261120  }
  0x4c   :  { %140 = vmatprep.mubr.bf16.mxu0 %v1903_v0  ;;  %v1732_v2 = vld [vmem:[#allocation5] ss:$8 sps:$4 sm:$0xff]   ;;  %108 = vmatprep.subr.bf16.mxu0 %v1730_v1  ;;  %v1733_v3 = vld [vmem:[#allocation5 + $0x14] ss:$8 sps:$4 sm:$0xff]   ;;  %v1735_v4 = vld [vmem:[#allocation5 + $0x10] ss:$8 sps:$4 sm:$0xff]  }
  0x4d   :  { %109 = vmatpush1.bf16.msra.mxu0 %v1732_v2  ;;  %v1736_v5 = vld [vmem:[#allocation2] sm:$0xff]   ;;  %v1904_v6 = vmov 0.0   ;;  %vm1905_vm1 = vmmov 0   ;;  %vm219_vm2 = vcmask 1043456   ;;  %s1906_s3 = smov 112   ;;  %s1907_s15 = smov 48  }
  0x4e   :  { %110 = vmatprep.subr.bf16.mxu0 %v1733_v3  ;;  %1568 = vmatprep.subr.bf16.mxu1 %v1904_v6  ;;  %vm156_vm3 = vcmask 130048   ;;  %vm203_vm4 = vcmask 64512   ;;  %s1908_s16 = smov 32   ;;  %s1909_s17 = smov 96   ;;  %v1737_v49 = vld [vmem:[#allocation7] sm:$0xff]   ;;  %v1738_v50 = vld [vmem:[#allocation7 + $0x8] sm:$0xff]  }
  0x4f   :  { %1570 = vmatprep.mubr.msk.bf16.mxu1 %vm1905_vm1, %v1904_v6  ;;  %s1910_s18 = smov 80   ;;  %s1911_s19 = smov 16  }
  0x51   :  { %111 = vmatpush1.bf16.msra.mxu0 %v1735_v4 }
  0x52   :  { %1574 = vmatprep.subr.bf16.mxu0 %v1904_v6 }
  0x54   :  { %1486 = vmatmul.mubr.msk.bf16.vlgmr.msra.gmra.mrb[0].mxu0 %vm104_vm0, %v1736_v5 }
  0x55   :  { %1576 = vmatprep.mubr.msk.bf16.mxu0 %vm1905_vm1, %v1904_v6 }
 0x127   :  { %v142_v7 = vpop.f32.mrb[0].mxu0 }
 0x128   :  { %v144_v8 = vpop.f32.mrb[1].mxu0 }
 0x129   :  { %v146_v9 = vpop.f32.mrb[2].mxu0 }
 0x12a   :  { %v2000_v10 = vpack.c.bf16 %v146_v9, %v142_v7  ;;  %v148_v11 = vpop.f32.mrb[3].mxu0 }
 0x12b   :  { %v2002_v12 = vpack.c.bf16 %v148_v11, %v144_v8 }
 0x12c   :  { %266 = vrot.lane.b32.xlu1 %v2000_v10, %s1906_s3  ;;  %154 = vrot.lane.b32.xlu0 %v2000_v10, %s1899_s1 }
 0x12d   :  { %v221_v13 = vsel %vm219_vm2, %v2002_v12, 0 }
 0x12e   :  { %1575 = vmatpush3.bf16.msra.mxu0 %v221_v13 }
 0x12f   :  { %1586 = vmatprep.subr.bf16.mxu0 %v1904_v6 }
 0x130   :  { %268 = vrot.lane.b32.xlu0 %v2000_v10, %s1907_s15 }
 0x19e   :  { %v155_v14 = vpop.permute.xlu0 %154  ;;  %v267_v18 = vpop.permute.xlu1 %266 }
 0x19f   :  { %v161_v15 = vsel %vm156_vm3, %v155_v14, 0 }
 0x1a0   :  { %1569 = vmatpush3.bf16.xpose.msra.mxu1 %v161_v15 }
 0x1a1   :  { %1580 = vmatprep.subr.bf16.mxu1 %v1904_v6 }
 0x1a2   :  { %v269_v16 = vpop.permute.xlu0 %268 }
 0x1a3   :  { %v274_v17 = vsel %vm156_vm3, %v269_v16, 0 }
 0x1a7   :  { %1571 = vmatmul.mubr.msk.bf16.vlgmr.msra.gmra.mrb[0].mxu1 %vm156_vm3, %v2000_v10 }
 0x1a8   :  { %1581 = vmatpush3.bf16.xpose.msra.mxu1 %v274_v17  ;;  %1582 = vmatprep.mubr.msk.bf16.mxu1 %vm1905_vm1, %v1904_v6 }
 0x1a9   :  { %1592 = vmatprep.subr.bf16.mxu1 %v1904_v6 }
 0x1af   :  { %1583 = vmatmul.mubr.msk.bf16.vlgmr.msra.gmra.mrb[4].mxu1 %vm156_vm3, %v267_v18 }
 0x1b0   :  { %1594 = vmatprep.mubr.msk.bf16.mxu1 %vm1905_vm1, %v1904_v6  ;;  %1593 = vmatpush3.bf16.msra.mxu1 %v1738_v50 }
 0x1b1   :  { %1604 = vmatprep.subr.bf16.mxu1 %v1904_v6 }
 0x27a   :  { %v197_v19 = vpop.f32.mrb[0].mxu1 }
 0x27b   :  { %v1572_v20 = vpop.f32.mrb[1].mxu1  ;;  %v204_v21 = vsel %vm203_vm4, %v197_v19, -inf }
 0x27c   :  { %205 = vmax.xlane.f32.xlu1 %v204_v21  ;;  %v200_v22 = vpop.f32.mrb[2].mxu1 }
 0x27d   :  { %v1573_v23 = vpop.f32.mrb[3].mxu1 }
 0x282   :  { %v310_v24 = vpop.f32.mrb[4].mxu1 }
 0x283   :  { %v1584_v25 = vpop.f32.mrb[5].mxu1  ;;  %v316_v26 = vsel %vm203_vm4, %v310_v24, -inf }
 0x284   :  { %317 = vmax.xlane.f32.xlu0 %v316_v26  ;;  %v313_v27 = vpop.f32.mrb[6].mxu1 }
 0x285   :  { %v1585_v28 = vpop.f32.mrb[7].mxu1 }
 0x309   :  { %v206_v29 = vpop.xlane.xlu1 %205 }
 0x30a   :  { %v207_v30 = vsub.f32 %v197_v19, %v206_v29 }
 0x30c   :  { %v208_v31 = vmul.f32 1.442695, %v207_v30 }
 0x30e   :  { %1745 = vpow2.f32 %v208_v31  ;;  %v1739_v31 = vld [vmem:[#allocation7 + $0x10] sm:$0xff]  }
 0x311   :  { %v318_v32 = vpop.xlane.xlu0 %317 }
 0x312   :  { %v319_v33 = vsub.f32 %v310_v24, %v318_v32 }
 0x314   :  { %v320_v34 = vmul.f32 1.442695, %v319_v33 }
 0x316   :  { %1747 = vpow2.f32 %v320_v34 }
 0x318   :  { %v1746_v35 = vpop.eup %1745 }
 0x319   :  { %v210_v36 = vsel %vm203_vm4, %v1746_v35, 0.0 }
 0x31a   :  { %211 = vadd.xlane.f32.xlu0 %v210_v36 }
 0x320   :  { %v1748_v37 = vpop.eup %1747 }
 0x321   :  { %v322_v38 = vsel %vm203_vm4, %v1748_v37, 0.0 }
 0x322   :  { %323 = vadd.xlane.f32.xlu1 %v322_v38 }
 0x330   :  { %329 = vrot.lane.b32.xlu0 %v2002_v12, %s1906_s3 }
 0x333   :  { %480 = vrot.lane.b32.xlu1 %v2000_v10, %s1908_s16 }
 0x337   :  { %478 = vrot.lane.b32.xlu1 %v2000_v10, %s1909_s17 }
 0x3a7   :  { %v212_v39 = vpop.xlane.xlu0 %211 }
 0x3a8   :  { %1749 = vrcp.f32 %v212_v39 }
 0x3ab   :  { %v330_v43 = vpop.permute.xlu0 %329 }
 0x3ac   :  { %v335_v45 = vsel %vm219_vm2, %v330_v43, 0 }
 0x3af   :  { %v324_v40 = vpop.xlane.xlu1 %323 }
 0x3b0   :  { %1751 = vrcp.f32 %v324_v40 }
 0x3b2   :  { %v1750_v41 = vpop.eup %1749 }
 0x3b3   :  { %v214_v42 = vmul.f32 %v1750_v41, %v1746_v35  ;;  %v481_v56 = vpop.permute.xlu1 %480 }
 0x3b4   :  { %v486_v61 = vsel %vm156_vm3, %v481_v56, 0 }
 0x3b5   :  { %v215_v44 = vpack.c.bf16 %v214_v42, %v214_v42  ;;  %v2081_v42 = vrot.slane %v2000_v10, 4 }
 0x3b7   :  { %1577 = vmatmul.mubr.msk.bf16.vlgmr.msra.gmra.mrb[4].mxu0 %vm203_vm4, %v215_v44  ;;  %v479_v63 = vpop.permute.xlu1 %478 }
 0x3b8   :  { %1587 = vmatpush3.bf16.msra.mxu0 %v335_v45  ;;  %1588 = vmatprep.mubr.msk.bf16.mxu0 %vm1905_vm1, %v1904_v6 }
 0x3b9   :  { %1598 = vmatprep.subr.bf16.mxu0 %v1904_v6 }
 0x3ba   :  { %v1752_v46 = vpop.eup %1751 }
 0x3bb   :  { %v326_v47 = vmul.f32 %v1752_v46, %v1748_v37 }
 0x3bd   :  { %v327_v48 = vpack.c.bf16 %v326_v47, %v326_v47 }
 0x3bf   :  { %1589 = vmatmul.mubr.msk.bf16.vlgmr.msra.gmra.mrb[8].mxu0 %vm203_vm4, %v327_v48 }
 0x3c0   :  { %1600 = vmatprep.mubr.msk.bf16.mxu0 %vm1905_vm1, %v1904_v6  ;;  %1599 = vmatpush3.bf16.msra.mxu0 %v1737_v49 }
 0x3c1   :  { %1610 = vmatprep.subr.bf16.mxu0 %v1904_v6 }
 0x48a   :  { %v257_v51 = vpop.f32.mrb[4].mxu0 }
 0x48b   :  { %v263_v52 = vpack.c.bf16 %v257_v51, %v257_v51  ;;  %v1578_v53 = vpop.f32.mrb[5].mxu0 }
 0x48c   :  { %v260_v54 = vpop.f32.mrb[6].mxu0 }
 0x48d   :  { %v1579_v55 = vpop.f32.mrb[7].mxu0  ;;  %1601 = vmatmul.mubr.msk.bf16.vlgmr.msra.gmra.mrb[12].mxu0 %vm156_vm3, %v263_v52 }
 0x48e   :  { %1612 = vmatprep.mubr.msk.bf16.mxu0 %vm1905_vm1, %v1904_v6 }
 0x492   :  { %v371_v57 = vpop.f32.mrb[8].mxu0 }
 0x493   :  { %v377_v58 = vpack.c.bf16 %v371_v57, %v371_v57  ;;  %v1590_v59 = vpop.f32.mrb[9].mxu0 }
 0x494   :  { %v374_v60 = vpop.f32.mrb[10].mxu0 }
 0x495   :  { %v1591_v62 = vpop.f32.mrb[11].mxu0  ;;  %1595 = vmatmul.mubr.msk.bf16.vlgmr.msra.gmra.mrb[8].mxu1 %vm156_vm3, %v377_v58 }
 0x496   :  { %1605 = vmatpush3.bf16.xpose.msra.mxu1 %v486_v61  ;;  %1606 = vmatprep.mubr.msk.bf16.mxu1 %vm1905_vm1, %v1904_v6 }
 0x497   :  { %1616 = vmatprep.subr.bf16.mxu1 %v1904_v6 }
 0x49d   :  { %1607 = vmatmul.mubr.msk.bf16.vlgmr.msra.gmra.mrb[12].mxu1 %vm156_vm3, %v479_v63 }
 0x49e   :  { %1618 = vmatprep.mubr.msk.bf16.mxu1 %vm1905_vm1, %v1904_v6  ;;  %1617 = vmatpush3.bf16.msra.mxu1 %v1739_v31 }
 0x49f   :  { %1628 = vmatprep.subr.bf16.mxu1 %v1904_v6 }
 0x560   :  { %v472_v0 = vpop.f32.mrb[12].mxu0 }
 0x561   :  { %v1602_v1 = vpop.f32.mrb[13].mxu0 }
 0x562   :  { %v475_v2 = vpop.f32.mrb[14].mxu0 }
 0x563   :  { %v1603_v3 = vpop.f32.mrb[15].mxu0 }
 0x568   :  { %v423_v4 = vpop.f32.mrb[8].mxu1 }
 0x569   :  { %v2055_v5 = vadd.f32 %v472_v0, %v423_v4  ;;  %v1596_v7 = vpop.f32.mrb[9].mxu1  ;;  %v2113_v0 = vrot.slane %v2002_v12, 4 }
 0x56a   :  { %v426_v8 = vpop.f32.mrb[10].mxu1 }
 0x56b   :  { %v1597_v9 = vpop.f32.mrb[11].mxu1  ;;  %v878_v7 = vsel %vm219_vm2, %v2113_v0, 0 }
 0x570   :  { %v522_v11 = vpop.f32.mrb[12].mxu1 }
 0x571   :  { %v1608_v13 = vpop.f32.mrb[13].mxu1  ;;  %v528_v14 = vsel %vm203_vm4, %v522_v11, -inf }
 0x572   :  { %529 = vmax.xlane.f32.xlu0 %v528_v14  ;;  %v525_v15 = vpop.f32.mrb[14].mxu1 }
 0x573   :  { %v1609_v16 = vpop.f32.mrb[15].mxu1 }
 0x588   :  { %540 = vrot.lane.b32.xlu0 %v2002_v12, %s1909_s17 }
 0x58c   :  { %641 = vrot.lane.b32.xlu0 %v2000_v10, %s1910_s18 }
 0x5ff   :  { %v530_v17 = vpop.xlane.xlu0 %529 }
 0x600   :  { %v531_v18 = vsub.f32 %v522_v11, %v530_v17 }
 0x602   :  { %v532_v19 = vmul.f32 1.442695, %v531_v18 }
 0x603   :  { %v541_v20 = vpop.permute.xlu0 %540 }
 0x604   :  { %1753 = vpow2.f32 %v532_v19  ;;  %v546_v21 = vsel %vm219_vm2, %v541_v20, 0 }
 0x605   :  { %1611 = vmatpush3.bf16.msra.mxu0 %v546_v21 }
 0x606   :  { %1622 = vmatprep.subr.bf16.mxu0 %v1904_v6 }
 0x607   :  { %v642_v30 = vpop.permute.xlu0 %641 }
 0x60e   :  { %v1754_v22 = vpop.eup %1753 }
 0x60f   :  { %v534_v23 = vsel %vm203_vm4, %v1754_v22, 0.0 }
 0x610   :  { %535 = vadd.xlane.f32.xlu1 %v534_v23 }
 0x621   :  { %643 = vrot.lane.b32.xlu1 %v2000_v10, %s1911_s19  ;;  %v1740_v10 = vld [vmem:[#allocation7 + $0x18] sm:$0xff]  }
 0x69d   :  { %v536_v24 = vpop.xlane.xlu1 %535 }
 0x69e   :  { %1755 = vrcp.f32 %v536_v24 }
 0x6a1   :  { %v644_v27 = vpop.permute.xlu1 %643 }
 0x6a2   :  { %v649_v29 = vsel %vm156_vm3, %v644_v27, 0 }
 0x6a8   :  { %v1756_v25 = vpop.eup %1755 }
 0x6a9   :  { %v538_v26 = vmul.f32 %v1756_v25, %v1754_v22 }
 0x6ab   :  { %v539_v28 = vpack.c.bf16 %v538_v26, %v538_v26 }
 0x6ad   :  { %1613 = vmatmul.mubr.msk.bf16.vlgmr.msra.gmra.mrb[16].mxu0 %vm203_vm4, %v539_v28 }
 0x6ae   :  { %1623 = vmatpush3.bf16.xpose.msra.mxu0 %v649_v29  ;;  %1624 = vmatprep.mubr.msk.bf16.mxu0 %vm1905_vm1, %v1904_v6  ;;  %v2131_v29 = vld [vmem:[#allocation8] ss:$0 sm:$0xff] }
 0x6af   :  { %1634 = vmatprep.subr.bf16.mxu0 %v1904_v6 }
 0x6b5   :  { %1625 = vmatmul.mubr.msk.bf16.vlgmr.msra.gmra.mrb[20].mxu0 %vm156_vm3, %v642_v30 }
 0x6b6   :  { %1636 = vmatprep.mubr.msk.bf16.mxu0 %vm1905_vm1, %v1904_v6  ;;  %1635 = vmatpush3.bf16.msra.mxu0 %v1740_v10  ;;  %v1742_v10 = vld [vmem:[#allocation7 + $0x8] sm:$0xff]  }
 0x6b7   :  { %1646 = vmatprep.subr.bf16.mxu0 %v1904_v6 }
 0x780   :  { %v582_v32 = vpop.f32.mrb[16].mxu0 }
 0x781   :  { %v588_v33 = vpack.c.bf16 %v582_v32, %v582_v32  ;;  %v1614_v34 = vpop.f32.mrb[17].mxu0 }
 0x782   :  { %v585_v35 = vpop.f32.mrb[18].mxu0 }
 0x783   :  { %v1615_v36 = vpop.f32.mrb[19].mxu0  ;;  %1619 = vmatmul.mubr.msk.bf16.vlgmr.msra.gmra.mrb[16].mxu1 %vm156_vm3, %v588_v33 }
 0x784   :  { %1630 = vmatprep.mubr.msk.bf16.mxu1 %vm1905_vm1, %v1904_v6 }
 0x788   :  { %v685_v37 = vpop.f32.mrb[20].mxu0 }
 0x789   :  { %v1626_v38 = vpop.f32.mrb[21].mxu0  ;;  %v691_v39 = vsel %vm203_vm4, %v685_v37, -inf }
 0x78a   :  { %692 = vmax.xlane.f32.xlu1 %v691_v39  ;;  %v688_v40 = vpop.f32.mrb[22].mxu0 }
 0x78b   :  { %v1627_v41 = vpop.f32.mrb[23].mxu0 }
 0x79b   :  { %813 = vrot.lane.b32.xlu1 %v2081_v42, %s1899_s1  ;;  %s1912_s1 = smov [#allocation10]  }
 0x79c   :  { %s1467_s20 = sshll.u32 %s1912_s1, 4  ;;  %s1468_s20 = int_to_ptr.vmem [resolvable:$true] %s1467_s20 }
 0x79d   :  { %s1865_s21 = scalar_lea.vmem %s1468_s20, 256  ;;  %p1870_p5 = scmp.lt.s32.totalorder %s1468_s20, %s1468_s20 }
 0x79e   :  { %p1866_p4 = scmp.ne.s32.totalorder %s1468_s20, %s1865_s21  ;;  %p1871_p6 = scmp.lt.s32.totalorder %s1865_s21, %s1865_s21 }
 0x79f   :  { %925 = vrot.lane.b32.xlu1 %v2081_v42, %s1907_s15 }
 0x7a0   :  { %p1872_p7 = por %p1871_p6, %p1870_p5 }
 0x7a2   :  { %p1873_p8 = pnand %p1872_p7, %p1866_p4 }
 0x817   :  { %v693_v43 = vpop.xlane.xlu1 %692 }
 0x818   :  { %v694_v44 = vsub.f32 %v685_v37, %v693_v43 }
 0x81a   :  { %v695_v45 = vmul.f32 1.442695, %v694_v44 }
 0x81b   :  { %v814_v58 = vpop.permute.xlu1 %813 }
 0x81c   :  { %1757 = vpow2.f32 %v695_v45  ;;  %v819_v60 = vsel %vm156_vm3, %v814_v58, 0 }
 0x81f   :  { %v926_v61 = vpop.permute.xlu1 %925 }
 0x820   :  { %v931_v62 = vsel %vm156_vm3, %v926_v61, 0 }
 0x826   :  { %v1758_v46 = vpop.eup %1757 }
 0x827   :  { %v697_v47 = vsel %vm203_vm4, %v1758_v46, 0.0 }
 0x828   :  { %698 = vadd.xlane.f32.xlu0 %v697_v47  ;;  %v1741_v47 = vld [vmem:[#allocation7] sm:$0xff]  }
 0x83e   :  { %703 = vrot.lane.b32.xlu0 %v2002_v12, %s1910_s18 }
 0x842   :  { %923 = vrot.lane.b32.xlu0 %v2081_v42, %s1906_s3 }
 0x856   :  { %v634_v48 = vpop.f32.mrb[16].mxu1 }
 0x857   :  { %v2093_v49 = vadd.f32 %v634_v48, %v2055_v5  ;;  %v1620_v50 = vpop.f32.mrb[17].mxu1 }
 0x858   :  { %v637_v51 = vpop.f32.mrb[18].mxu1 }
 0x859   :  { %v1621_v52 = vpop.f32.mrb[19].mxu1 }
 0x8b5   :  { %v699_v53 = vpop.xlane.xlu0 %698 }
 0x8b6   :  { %1759 = vrcp.f32 %v699_v53 }
 0x8b9   :  { %v704_v54 = vpop.permute.xlu0 %703 }
 0x8ba   :  { %v709_v55 = vsel %vm219_vm2, %v704_v54, 0 }
 0x8bb   :  { %1629 = vmatpush3.bf16.msra.mxu1 %v709_v55 }
 0x8bc   :  { %1640 = vmatprep.subr.bf16.mxu1 %v1904_v6 }
 0x8bd   :  { %v924_v63 = vpop.permute.xlu0 %923 }
 0x8c0   :  { %v1760_v56 = vpop.eup %1759 }
 0x8c1   :  { %v701_v57 = vmul.f32 %v1760_v56, %v1758_v46 }
 0x8c3   :  { %v702_v59 = vpack.c.bf16 %v701_v57, %v701_v57 }
 0x8c5   :  { %1631 = vmatmul.mubr.msk.bf16.vlgmr.msra.gmra.mrb[20].mxu1 %vm203_vm4, %v702_v59 }
 0x8c6   :  { %1641 = vmatpush3.bf16.xpose.msra.mxu1 %v819_v60  ;;  %1642 = vmatprep.mubr.msk.bf16.mxu1 %vm1905_vm1, %v1904_v6 }
 0x8c7   :  { %1652 = vmatprep.subr.bf16.mxu1 %v1904_v6 }
 0x8cd   :  { %1643 = vmatmul.mubr.msk.bf16.vlgmr.msra.gmra.mrb[24].mxu1 %vm156_vm3, %v2081_v42 }
 0x8ce   :  { %1653 = vmatpush3.bf16.xpose.msra.mxu1 %v931_v62  ;;  %1654 = vmatprep.mubr.msk.bf16.mxu1 %vm1905_vm1, %v1904_v6 }
 0x8cf   :  { %1664 = vmatprep.subr.bf16.mxu1 %v1904_v6 }
 0x8d5   :  { %1655 = vmatmul.mubr.msk.bf16.vlgmr.msra.gmra.mrb[28].mxu1 %vm156_vm3, %v924_v63 }
 0x8d6   :  { %1666 = vmatprep.mubr.msk.bf16.mxu1 %vm1905_vm1, %v1904_v6  ;;  %1665 = vmatpush3.bf16.msra.mxu1 %v1742_v10 }
 0x8d7   :  { %1676 = vmatprep.subr.bf16.mxu1 %v1904_v6 }
 0x998   :  { %v745_v1 = vpop.f32.mrb[20].mxu1 }
 0x999   :  { %v751_v2 = vpack.c.bf16 %v745_v1, %v745_v1  ;;  %v1632_v3 = vpop.f32.mrb[21].mxu1 }
 0x99a   :  { %v748_v4 = vpop.f32.mrb[22].mxu1 }
 0x99b   :  { %v1633_v5 = vpop.f32.mrb[23].mxu1  ;;  %1637 = vmatmul.mubr.msk.bf16.vlgmr.msra.gmra.mrb[24].mxu0 %vm156_vm3, %v751_v2 }
 0x99c   :  { %1647 = vmatpush3.bf16.msra.mxu0 %v878_v7  ;;  %1648 = vmatprep.mubr.msk.bf16.mxu0 %vm1905_vm1, %v1904_v6 }
 0x99d   :  { %1658 = vmatprep.subr.bf16.mxu0 %v1904_v6 }
 0x9a0   :  { %v855_v8 = vpop.f32.mrb[24].mxu1 }
 0x9a1   :  { %v1644_v9 = vpop.f32.mrb[25].mxu1  ;;  %v861_v12 = vsel %vm203_vm4, %v855_v8, -inf }
 0x9a2   :  { %862 = vmax.xlane.f32.xlu1 %v861_v12  ;;  %v858_v11 = vpop.f32.mrb[26].mxu1 }
 0x9a3   :  { %v1645_v13 = vpop.f32.mrb[27].mxu1 }
 0x9a8   :  { %v967_v14 = vpop.f32.mrb[28].mxu1 }
 0x9a9   :  { %v1656_v15 = vpop.f32.mrb[29].mxu1  ;;  %v973_v16 = vsel %vm203_vm4, %v967_v14, -inf }
 0x9aa   :  { %974 = vmax.xlane.f32.xlu0 %v973_v16  ;;  %v970_v17 = vpop.f32.mrb[30].mxu1 }
 0x9ab   :  { %v1657_v18 = vpop.f32.mrb[31].mxu1 }
 0xa2f   :  { %v863_v19 = vpop.xlane.xlu1 %862 }
 0xa30   :  { %v864_v20 = vsub.f32 %v855_v8, %v863_v19 }
 0xa32   :  { %v865_v21 = vmul.f32 1.442695, %v864_v20 }
 0xa34   :  { %1761 = vpow2.f32 %v865_v21 }
 0xa37   :  { %v975_v22 = vpop.xlane.xlu0 %974 }
 0xa38   :  { %v976_v23 = vsub.f32 %v967_v14, %v975_v22 }
 0xa3a   :  { %v977_v24 = vmul.f32 1.442695, %v976_v23 }
 0xa3c   :  { %1763 = vpow2.f32 %v977_v24 }
 0xa3e   :  { %v1762_v25 = vpop.eup %1761 }
 0xa3f   :  { %v867_v26 = vsel %vm203_vm4, %v1762_v25, 0.0 }
 0xa40   :  { %868 = vadd.xlane.f32.xlu0 %v867_v26 }
 0xa46   :  { %v1764_v27 = vpop.eup %1763 }
 0xa47   :  { %v979_v28 = vsel %vm203_vm4, %v1764_v27, 0.0 }
 0xa48   :  { %980 = vadd.xlane.f32.xlu1 %v979_v28 }
 0xa56   :  { %985 = vrot.lane.b32.xlu0 %v2113_v0, %s1906_s3 }
 0xa59   :  { %1136 = vrot.lane.b32.xlu1 %v2081_v42, %s1908_s16 }
 0xa5d   :  { %1134 = vrot.lane.b32.xlu1 %v2081_v42, %s1909_s17 }
 0xa6e   :  { %v797_v30 = vpop.f32.mrb[24].mxu0 }
 0xa6f   :  { %v803_v31 = vadd.f32 %v797_v30, %v2093_v49  ;;  %v1638_v32 = vpop.f32.mrb[25].mxu0 }
 0xa70   :  { %v800_v33 = vpop.f32.mrb[26].mxu0 }
 0xa71   :  { %v810_v34 = vadd.f32 %v2131_v29, %v803_v31  ;;  %v1639_v35 = vpop.f32.mrb[27].mxu0 }
 0xa73   :  { %811 = vst.msk [vmem:[#allocation10] sm:$0xff] %vm104_vm0, %v810_v34 }
 0xacd   :  { %v869_v36 = vpop.xlane.xlu0 %868 }
 0xace   :  { %1765 = vrcp.f32 %v869_v36 }
 0xad1   :  { %v986_v40 = vpop.permute.xlu0 %985 }
 0xad2   :  { %v991_v43 = vsel %vm219_vm2, %v986_v40, 0 }
 0xad5   :  { %v981_v37 = vpop.xlane.xlu1 %980 }
 0xad6   :  { %1767 = vrcp.f32 %v981_v37 }
 0xad8   :  { %v1766_v38 = vpop.eup %1765 }
 0xad9   :  { %v871_v39 = vmul.f32 %v1766_v38, %v1762_v25  ;;  %v1137_v53 = vpop.permute.xlu1 %1136 }
 0xada   :  { %v1142_v58 = vsel %vm156_vm3, %v1137_v53, 0 }
 0xadb   :  { %v872_v41 = vpack.c.bf16 %v871_v39, %v871_v39 }
 0xadd   :  { %1649 = vmatmul.mubr.msk.bf16.vlgmr.msra.gmra.mrb[28].mxu0 %vm203_vm4, %v872_v41  ;;  %v1135_v60 = vpop.permute.xlu1 %1134 }
 0xade   :  { %1659 = vmatpush3.bf16.msra.mxu0 %v991_v43  ;;  %1660 = vmatprep.mubr.msk.bf16.mxu0 %vm1905_vm1, %v1904_v6 }
 0xadf   :  { %1670 = vmatprep.subr.bf16.mxu0 %v1904_v6 }
 0xae0   :  { %v1768_v44 = vpop.eup %1767 }
 0xae1   :  { %v983_v45 = vmul.f32 %v1768_v44, %v1764_v27 }
 0xae3   :  { %v984_v46 = vpack.c.bf16 %v983_v45, %v983_v45  ;;  %v1744_v45 = vld [vmem:[#allocation7 + $0x18] sm:$0xff]  }
 0xae5   :  { %1661 = vmatmul.mubr.msk.bf16.vlgmr.msra.gmra.mrb[32].mxu0 %vm203_vm4, %v984_v46 }
 0xae6   :  { %1672 = vmatprep.mubr.msk.bf16.mxu0 %vm1905_vm1, %v1904_v6  ;;  %1671 = vmatpush3.bf16.msra.mxu0 %v1741_v47 }
 0xae7   :  { %1682 = vmatprep.subr.bf16.mxu0 %v1904_v6 }
 0xbb0   :  { %v914_v48 = vpop.f32.mrb[28].mxu0 }
 0xbb1   :  { %v920_v49 = vpack.c.bf16 %v914_v48, %v914_v48  ;;  %v1650_v50 = vpop.f32.mrb[29].mxu0 }
 0xbb2   :  { %v917_v51 = vpop.f32.mrb[30].mxu0 }
 0xbb3   :  { %v1651_v52 = vpop.f32.mrb[31].mxu0  ;;  %1673 = vmatmul.mubr.msk.bf16.vlgmr.msra.gmra.mrb[36].mxu0 %vm156_vm3, %v920_v49 }
 0xbb4   :  { %1684 = vmatprep.mubr.msk.bf16.mxu0 %vm1905_vm1, %v1904_v6 }
 0xbb8   :  { %v1027_v54 = vpop.f32.mrb[32].mxu0 }
 0xbb9   :  { %v1033_v55 = vpack.c.bf16 %v1027_v54, %v1027_v54  ;;  %v1662_v56 = vpop.f32.mrb[33].mxu0 }
 0xbba   :  { %v1030_v57 = vpop.f32.mrb[34].mxu0 }
 0xbbb   :  { %v1663_v59 = vpop.f32.mrb[35].mxu0  ;;  %1667 = vmatmul.mubr.msk.bf16.vlgmr.msra.gmra.mrb[32].mxu1 %vm156_vm3, %v1033_v55 }
 0xbbc   :  { %1677 = vmatpush3.bf16.xpose.msra.mxu1 %v1142_v58  ;;  %1678 = vmatprep.mubr.msk.bf16.mxu1 %vm1905_vm1, %v1904_v6 }
 0xbbd   :  { %1688 = vmatprep.subr.bf16.mxu1 %v1904_v6 }
 0xbc3   :  { %1679 = vmatmul.mubr.msk.bf16.vlgmr.msra.gmra.mrb[36].mxu1 %vm156_vm3, %v1135_v60 }
 0xbc4   :  { %1690 = vmatprep.mubr.msk.bf16.mxu1 %vm1905_vm1, %v1904_v6 }
 0xc86   :  { %v1128_v61 = vpop.f32.mrb[36].mxu0 }
 0xc87   :  { %v1674_v62 = vpop.f32.mrb[37].mxu0 }
 0xc88   :  { %v1131_v63 = vpop.f32.mrb[38].mxu0 }
 0xc89   :  { %v1675_v1 = vpop.f32.mrb[39].mxu0 }
 0xc8e   :  { %v1079_v2 = vpop.f32.mrb[32].mxu1 }
 0xc8f   :  { %v2157_v3 = vadd.f32 %v1128_v61, %v1079_v2  ;;  %v1668_v4 = vpop.f32.mrb[33].mxu1 }
 0xc90   :  { %v1082_v5 = vpop.f32.mrb[34].mxu1 }
 0xc91   :  { %v1669_v7 = vpop.f32.mrb[35].mxu1 }
 0xc96   :  { %v1178_v8 = vpop.f32.mrb[36].mxu1 }
 0xc97   :  { %v1680_v9 = vpop.f32.mrb[37].mxu1  ;;  %v1184_v12 = vsel %vm203_vm4, %v1178_v8, -inf }
 0xc98   :  { %1185 = vmax.xlane.f32.xlu0 %v1184_v12  ;;  %v1181_v11 = vpop.f32.mrb[38].mxu1 }
 0xc99   :  { %v1681_v13 = vpop.f32.mrb[39].mxu1 }
 0xcae   :  { %1196 = vrot.lane.b32.xlu0 %v2113_v0, %s1909_s17 }
 0xcb2   :  { %1297 = vrot.lane.b32.xlu0 %v2081_v42, %s1910_s18 }
 0xd25   :  { %v1186_v14 = vpop.xlane.xlu0 %1185 }
 0xd26   :  { %v1187_v15 = vsub.f32 %v1178_v8, %v1186_v14 }
 0xd28   :  { %v1188_v16 = vmul.f32 1.442695, %v1187_v15 }
 0xd29   :  { %v1197_v17 = vpop.permute.xlu0 %1196 }
 0xd2a   :  { %1769 = vpow2.f32 %v1188_v16  ;;  %v1202_v18 = vsel %vm219_vm2, %v1197_v17, 0 }
 0xd2b   :  { %1683 = vmatpush3.bf16.msra.mxu0 %v1202_v18 }
 0xd2c   :  { %1694 = vmatprep.subr.bf16.mxu0 %v1904_v6 }
 0xd2d   :  { %v1298_v27 = vpop.permute.xlu0 %1297 }
 0xd34   :  { %v1770_v19 = vpop.eup %1769 }
 0xd35   :  { %v1190_v20 = vsel %vm203_vm4, %v1770_v19, 0.0 }
 0xd36   :  { %1191 = vadd.xlane.f32.xlu1 %v1190_v20 }
 0xd47   :  { %1299 = vrot.lane.b32.xlu1 %v2081_v42, %s1911_s19  ;;  %v1743_v42 = vld [vmem:[#allocation7 + $0x10] sm:$0xff]  }
 0xd48   :  { %1689 = vmatpush3.bf16.msra.mxu1 %v1743_v42 }
 0xd49   :  { %1700 = vmatprep.subr.bf16.mxu1 %v1904_v6 }
 0xdc3   :  { %v1192_v21 = vpop.xlane.xlu1 %1191 }
 0xdc4   :  { %1771 = vrcp.f32 %v1192_v21 }
 0xdc7   :  { %v1300_v24 = vpop.permute.xlu1 %1299 }
 0xdc8   :  { %v1305_v26 = vsel %vm156_vm3, %v1300_v24, 0 }
 0xdce   :  { %v1772_v22 = vpop.eup %1771 }
 0xdcf   :  { %v1194_v23 = vmul.f32 %v1772_v22, %v1770_v19 }
 0xdd1   :  { %v1195_v25 = vpack.c.bf16 %v1194_v23, %v1194_v23 }
 0xdd3   :  { %1685 = vmatmul.mubr.msk.bf16.vlgmr.msra.gmra.mrb[40].mxu0 %vm203_vm4, %v1195_v25 }
 0xdd4   :  { %1695 = vmatpush3.bf16.xpose.msra.mxu0 %v1305_v26  ;;  %1696 = vmatprep.mubr.msk.bf16.mxu0 %vm1905_vm1, %v1904_v6 }
 0xdd5   :  { %1706 = vmatprep.subr.bf16.mxu0 %v1904_v6 }
 0xddb   :  { %1697 = vmatmul.mubr.msk.bf16.vlgmr.msra.gmra.mrb[44].mxu0 %vm156_vm3, %v1298_v27 }
 0xddc   :  { %1708 = vmatprep.mubr.msk.bf16.mxu0 %vm1905_vm1, %v1904_v6  ;;  %1707 = vmatpush3.bf16.msra.mxu0 %v1744_v45 }
 0xea6   :  { %v1238_v28 = vpop.f32.mrb[40].mxu0 }
 0xea7   :  { %v1244_v30 = vpack.c.bf16 %v1238_v28, %v1238_v28  ;;  %v1686_v31 = vpop.f32.mrb[41].mxu0 }
 0xea8   :  { %v1241_v32 = vpop.f32.mrb[42].mxu0 }
 0xea9   :  { %v1687_v33 = vpop.f32.mrb[43].mxu0  ;;  %1691 = vmatmul.mubr.msk.bf16.vlgmr.msra.gmra.mrb[40].mxu1 %vm156_vm3, %v1244_v30 }
 0xeaa   :  { %1702 = vmatprep.mubr.msk.bf16.mxu1 %vm1905_vm1, %v1904_v6 }
 0xeae   :  { %v1341_v34 = vpop.f32.mrb[44].mxu0 }
 0xeaf   :  { %v1698_v35 = vpop.f32.mrb[45].mxu0  ;;  %v1347_v36 = vsel %vm203_vm4, %v1341_v34, -inf }
 0xeb0   :  { %1348 = vmax.xlane.f32.xlu1 %v1347_v36  ;;  %v1344_v37 = vpop.f32.mrb[46].mxu0 }
 0xeb1   :  { %v1699_v38 = vpop.f32.mrb[47].mxu0 }
 0xf3d   :  { %v1349_v39 = vpop.xlane.xlu1 %1348 }
 0xf3e   :  { %v1350_v40 = vsub.f32 %v1341_v34, %v1349_v39 }
 0xf40   :  { %v1351_v41 = vmul.f32 1.442695, %v1350_v40 }
 0xf42   :  { %1773 = vpow2.f32 %v1351_v41 }
 0xf4c   :  { %v1774_v43 = vpop.eup %1773 }
 0xf4d   :  { %v1353_v44 = vsel %vm203_vm4, %v1774_v43, 0.0 }
 0xf4e   :  { %1354 = vadd.xlane.f32.xlu0 %v1353_v44 }
 0xf64   :  { %1359 = vrot.lane.b32.xlu0 %v2113_v0, %s1910_s18 }
 0xf7c   :  { %v1290_v6 = vpop.f32.mrb[40].mxu1 }
 0xf7d   :  { %v1296_v46 = vadd.f32 %v1290_v6, %v2157_v3  ;;  %v1692_v47 = vpop.f32.mrb[41].mxu1 }
 0xf7e   :  { %v1293_v10 = vpop.f32.mrb[42].mxu1 }
 0xf7f   :  { %v1693_v48 = vpop.f32.mrb[43].mxu1 }
 0xfdb   :  { %v1355_v49 = vpop.xlane.xlu0 %1354 }
 0xfdc   :  { %1775 = vrcp.f32 %v1355_v49 }
 0xfdf   :  { %v1360_v50 = vpop.permute.xlu0 %1359 }
 0xfe0   :  { %v1365_v51 = vsel %vm219_vm2, %v1360_v50, 0 }
 0xfe1   :  { %1701 = vmatpush3.bf16.msra.mxu1 %v1365_v51 }
 0xfe6   :  { %v1776_v52 = vpop.eup %1775 }
 0xfe7   :  { %v1357_v53 = vmul.f32 %v1776_v52, %v1774_v43 }
 0xfe9   :  { %v1358_v54 = vpack.c.bf16 %v1357_v53, %v1357_v53 }
 0xfeb   :  { %1703 = vmatmul.mubr.msk.bf16.vlgmr.msra.gmra.mrb[44].mxu1 %vm203_vm4, %v1358_v54 }
0x10be   :  { %v1401_v0 = vpop.f32.mrb[44].mxu1 }
0x10bf   :  { %v1407_v55 = vpack.c.bf16 %v1401_v0, %v1401_v0  ;;  %v1704_v56 = vpop.f32.mrb[45].mxu1 }
0x10c0   :  { %v1404_v57 = vpop.f32.mrb[46].mxu1 }
0x10c1   :  { %v1705_v58 = vpop.f32.mrb[47].mxu1  ;;  %1709 = vmatmul.mubr.msk.bf16.vlgmr.msra.gmra.mrb[48].mxu0 %vm156_vm3, %v1407_v55 }
0x1194   :  { %v1453_v59 = vpop.f32.mrb[48].mxu0 }
0x1195   :  { %v1459_v60 = vadd.f32 %v1453_v59, %v1296_v46  ;;  %v1710_v61 = vpop.f32.mrb[49].mxu0 }
0x1196   :  { %v1456_v62 = vpop.f32.mrb[50].mxu0 }
0x1197   :  { %v1460_v63 = vadd.f32 %v2131_v29, %v1459_v60  ;;  %v1711_v1 = vpop.f32.mrb[51].mxu0 }
0x1199   :  { %1461 = vst.msk [vmem:[#allocation10 + $0x8] sm:$0xff] %vm104_vm0, %v1460_v63 }
0x119a   :  { %1876 = shalt.err (!%p1873_p8)
}
0x119b   :  { %s1877_s24 = scalar_lea.hbm %s2210_s4, 256 }
0x119c   :  { %p1878_p9 = scmp.ne.s32.totalorder %s2210_s4, %s1877_s24  ;;  %p1881_p10 = scmp.lt.u32.totalorder %s1877_s24, %s2210_s4 }
0x119e   :  { %p1883_p11 = pnand %p1881_p10, %p1878_p9 }
0x11a0   :  { %1886 = shalt.err (!%p1883_p11)
}
0x11a1   :  { %1473 = dma.vmem_to_hbm [thread:$0]  %s1468_s20, 256, %s2210_s4, [#allocation4], %s1896_s25, %s1896_s25, %s1897_s26  }
0x11a2   :  { %1893 = dma.done.wait [#allocation4], 256  }
0x11a3   :  { %1894 = vsyncadd [#allocation4], 4294967040 }
0x11a4   :  { %1477 = vsyncpa [#allocation3], 1 }
0x11a5   :  { %1478 = vsyncpa [#allocation6], 1 }
0x11a6   :  { %1479 = vsyncpa [#allocation9], 1 }
0x11a7   :  { %1480 = vsyncpa [#allocation4], 1 }

</bundles_post_ra>
